<compile_context>
chip_gen: v7x
topology: tpu7x:2x2x1
jax: 0.10.0
libtpu: 0.0.40
codegen_flags: <defaults>
</compile_context>

<pallas_src>
import functools

import jax
import jax.numpy as jnp
from jax.experimental import pallas as pl
from jax.experimental.pallas import tpu as pltpu


def _round_up(x, m):
    return (x + m - 1) // m * m


def _pick_rows_tile(n, cap=1024):
    assert n % 8 == 0, n
    t = min(n, cap)
    while n % t:
        t -= 8
    return t


# ----------------------------------------------------------------------------
# Pallas kernels
# ----------------------------------------------------------------------------
def _linear_kernel(a_ref, w_ref, bias_ref, o_ref):
    acc = jnp.dot(a_ref[...], w_ref[...], preferred_element_type=jnp.float32)
    o_ref[...] = (acc + bias_ref[...]).astype(o_ref.dtype)


def _convt_fused_kernel(a_ref, w_ref, scale_ref, shift_ref, bias_ref, o_ref):
    # Fused: BN affine + ReLU on the A tile (f32), bf16 MXU matmul with f32
    # accumulation, per-sample label bias in the epilogue, bf16 writeback.
    a = a_ref[...].astype(jnp.float32) * scale_ref[...] + shift_ref[...]
    a = jnp.maximum(a, 0.0).astype(jnp.bfloat16)
    acc = jnp.dot(a, w_ref[...], preferred_element_type=jnp.float32)
    o_ref[...] = (acc + bias_ref[...][0]).astype(o_ref.dtype)


def _bn_stats_kernel(x_ref, g_ref, b_ref, scale_ref, shift_ref,
                     off_ref, sum_ref, ssq_ref, *, n_rows, eps):
    # Offset-shifted single-pass batch stats (train-mode BatchNorm2d on a
    # freshly constructed module): centering by the first row avoids
    # E[x^2] - E[x]^2 cancellation when |mean| >> std.
    i = pl.program_id(0)
    x = x_ref[...].astype(jnp.float32)

    @pl.when(i == 0)
    def _():
        off_ref[...] = x[0:1, :]
        sum_ref[...] = jnp.zeros_like(sum_ref)
        ssq_ref[...] = jnp.zeros_like(ssq_ref)

    xc = x - off_ref[...]
    sum_ref[...] += jnp.sum(xc, axis=0, keepdims=True)
    ssq_ref[...] += jnp.sum(xc * xc, axis=0, keepdims=True)

    @pl.when(i == pl.num_programs(0) - 1)
    def _():
        inv_n = 1.0 / n_rows
        mean_c = sum_ref[...] * inv_n
        var = jnp.maximum(ssq_ref[...] * inv_n - mean_c * mean_c, 0.0)
        mean = mean_c + off_ref[...]
        scale = g_ref[...] * jax.lax.rsqrt(var + eps)
        scale_ref[...] = scale
        shift_ref[...] = b_ref[...] - mean * scale


def _tanh_kernel(x_ref, o_ref):
    o_ref[...] = jnp.tanh(x_ref[...].astype(jnp.float32))


# ----------------------------------------------------------------------------
# Pallas wrappers
# ----------------------------------------------------------------------------
def linear_pallas(a, w, bias):
    """a: (M, K), w: (K, N) bf16, bias: (1, N) f32 -> (M, N) bf16.  K, N are
    pre-padded to multiples of 128 in pack_params; bias fused in epilogue."""
    M, K = a.shape
    K2, N = w.shape
    assert K == K2 and K % 128 == 0 and N % 128 == 0
    a = a.astype(jnp.bfloat16)
    Mp = _round_up(M, 8)
    if Mp != M:
        a = jnp.pad(a, ((0, Mp - M), (0, 0)))
    tn = min(N, 4096)
    while N % tn:
        tn -= 128
    out = pl.pallas_call(
        _linear_kernel,
        out_shape=jax.ShapeDtypeStruct((Mp, N), jnp.bfloat16),
        grid=(N // tn,),
        in_specs=[pl.BlockSpec((Mp, K), lambda j: (0, 0)),
                  pl.BlockSpec((K, tn), lambda j: (0, j)),
                  pl.BlockSpec((1, tn), lambda j: (0, j))],
        out_specs=pl.BlockSpec((Mp, tn), lambda j: (0, j)),
        compiler_params=pltpu.CompilerParams(
            dimension_semantics=("parallel",)),
    )(a, w, bias)
    return out[:M] if Mp != M else out


def convt_matmul_fused(a, w, scale, shift, y_bias, hw):
    """Fused BN-affine+ReLU -> (B*hw, K) x (K, Np) matmul -> + per-sample
    label bias, bf16 out.

    a: (B*hw, K) raw (pre-BN) bf16 activation, batch-major rows.
    w: (K, Np) bf16 packed taps.  scale/shift: (1, K) f32.
    y_bias: (B, 1, Np) f32 = one_hot @ W_label (the folded ConvConcatLayer).
    """
    M, K = a.shape
    B = M // hw
    Np = w.shape[1]
    assert w.shape[0] == K and K % 128 == 0 and Np % 128 == 0 and hw % 8 == 0
    tn = min(Np, 4096)
    while Np % tn:
        tn -= 128
    nt = Np // tn
    return pl.pallas_call(
        _convt_fused_kernel,
        out_shape=jax.ShapeDtypeStruct((M, Np), jnp.bfloat16),
        # batch axis innermost -> the weight block index is constant over it,
        # so each weight tile is DMA'd only once per layer.
        grid=(nt, B),
        in_specs=[pl.BlockSpec((hw, K), lambda j, b: (b, 0)),
                  pl.BlockSpec((K, tn), lambda j, b: (0, j)),
                  pl.BlockSpec((1, K), lambda j, b: (0, 0)),
                  pl.BlockSpec((1, K), lambda j, b: (0, 0)),
                  pl.BlockSpec((1, 1, tn), lambda j, b: (b, 0, j))],
        out_specs=pl.BlockSpec((hw, tn), lambda j, b: (b, j)),
        compiler_params=pltpu.CompilerParams(
            dimension_semantics=("parallel", "parallel")),
    )(a, w, scale, shift, y_bias)


def bn_scale_shift(x2d, gamma, beta, eps=1e-5):
    """Train-mode BatchNorm batch stats over rows of a (n, C) bf16 view.
    Returns (scale, shift), each (1, C) f32, so that y = x * scale + shift."""
    n, C = x2d.shape
    tr = _pick_rows_tile(n)
    g2 = gamma.reshape(1, C).astype(jnp.float32)
    b2 = beta.reshape(1, C).astype(jnp.float32)
    return pl.pallas_call(
        functools.partial(_bn_stats_kernel, n_rows=float(n), eps=eps),
        out_shape=(jax.ShapeDtypeStruct((1, C), jnp.float32),
                   jax.ShapeDtypeStruct((1, C), jnp.float32)),
        grid=(n // tr,),
        in_specs=[pl.BlockSpec((tr, C), lambda i: (i, 0)),
                  pl.BlockSpec((1, C), lambda i: (0, 0)),
                  pl.BlockSpec((1, C), lambda i: (0, 0))],
        out_specs=(pl.BlockSpec((1, C), lambda i: (0, 0)),
                   pl.BlockSpec((1, C), lambda i: (0, 0))),
        scratch_shapes=[pltpu.VMEM((1, C), jnp.float32)] * 3,
        compiler_params=pltpu.CompilerParams(
            dimension_semantics=("arbitrary",)),
    )(x2d, g2, b2)


def tanh_pallas_lane_dense(x):
    """Elementwise tanh on a lane-dense (rows, 128) view of bf16 NHWC x."""
    B, H, W, C = x.shape
    total = B * H * W * C
    assert total % 128 == 0
    rows = total // 128
    x2 = x.reshape(rows, 128)
    cap = rows // 2 if rows >= 16 else rows       # >=2 blocks for megacore
    tr = _pick_rows_tile(rows, cap=min(1024, cap))
    out = pl.pallas_call(
        _tanh_kernel,
        out_shape=jax.ShapeDtypeStruct((rows, 128), jnp.float32),
        grid=(rows // tr,),
        in_specs=[pl.BlockSpec((tr, 128), lambda i: (i, 0))],
        out_specs=pl.BlockSpec((tr, 128), lambda i: (i, 0)),
        compiler_params=pltpu.CompilerParams(
            dimension_semantics=("parallel",)),
    )(x2)
    return out.reshape(B, H, W, C)


# ----------------------------------------------------------------------------
# Module pieces (thin plain-JAX glue around the Pallas hot paths)
# ----------------------------------------------------------------------------
def col2im_s2k4p1(mm, B, H, W, c_out):
    """col2im for ConvTranspose2d(k=4, s=2, p=1): tap (kh, kw) of input pixel
    (i, j) lands at output (2i-1+kh, 2j-1+kw), so every output pixel is the
    sum of exactly 2x2 taps -> 4 shifted adds.  bf16 in/out, f32 adds."""
    y = mm[:, :16 * c_out].astype(jnp.float32).reshape(B, H, W, 4, 4, c_out)
    # rows (kh taps): even output rows <- kh {1,3}; odd output rows <- kh {0,2}
    zr = jnp.zeros((B, 1, W, 4, c_out), y.dtype)
    row_even = y[:, :, :, 1] + jnp.concatenate([zr, y[:, :-1, :, 3]], axis=1)
    row_odd = y[:, :, :, 2] + jnp.concatenate([y[:, 1:, :, 0], zr], axis=1)
    r = jnp.stack([row_even, row_odd], axis=2).reshape(B, 2 * H, W, 4, c_out)
    # cols (kw taps)
    zc = jnp.zeros((B, 2 * H, 1, c_out), y.dtype)
    col_even = r[:, :, :, 1] + jnp.concatenate([zc, r[:, :, :-1, 3]], axis=2)
    col_odd = r[:, :, :, 2] + jnp.concatenate([r[:, :, 1:, 0], zc], axis=2)
    out = jnp.stack([col_even, col_odd], axis=3).reshape(B, 2 * H, 2 * W, c_out)
    # TODO(synk): move these shifted adds (and the next layer's BN-stats
    # accumulation) into a Pallas col2im kernel to avoid the XLA stack copies.
    return out.astype(jnp.bfloat16)


def conv_block(x, gamma, beta, w_xp, w_yp, y_onehot, c_out):
    """BatchNorm(batch stats) + ReLU + ConvConcatLayer + ConvTranspose2d, with
    the affine+ReLU and label term fused into one Pallas matmul."""
    B, H, W, C = x.shape
    hw = H * W
    Np = w_xp.shape[1]
    scale, shift = bn_scale_shift(x.reshape(B * hw, C), gamma, beta)
    y_bias = (y_onehot.astype(jnp.float32) @ w_yp).reshape(B, 1, Np)
    mm = convt_matmul_fused(x.reshape(B * hw, C), w_xp, scale, shift, y_bias, hw)
    return col2im_s2k4p1(mm, B, H, W, c_out)


def generator_forward(z, y_onehot, p):
    """Equivalent of _G.forward.  z: (B, 100), y_onehot: (B, num_classes)."""
    B = z.shape[0]
    # MLPConcatLayer + Linear(110 -> 4*4*512); K zero-padded 110 -> 128, bias
    # fused; weight columns pre-permuted so the reshape below is already NHWC.
    h = jnp.concatenate([z, y_onehot], axis=1).astype(jnp.float32)
    h = jnp.pad(h, ((0, 0), (0, p["lin_w_t"].shape[0] - h.shape[1])))
    h = linear_pallas(h, p["lin_w_t"], p["lin_b"])                # (B,8192) bf16
    x = h.reshape(B, 4, 4, 512)                                   # NHWC, no copy
    x = conv_block(x, p["bn1_g"], p["bn1_b"], p["w2_xp"], p["w2_yp"], y_onehot, 256)
    x = conv_block(x, p["bn2_g"], p["bn2_b"], p["w3_xp"], p["w3_yp"], y_onehot, 128)
    x = conv_block(x, p["bn3_g"], p["bn3_b"], p["w4_xp"], p["w4_yp"], y_onehot, 3)
    x = tanh_pallas_lane_dense(x)                                 # (B,32,32,3) f32
    return x.transpose(0, 3, 1, 2)                                # NCHW (B,3,32,32)


# ----------------------------------------------------------------------------
# Parameters
# ----------------------------------------------------------------------------
def init_params(key, num_classes):
    """Parameters in the PyTorch module's native layouts (f32)."""
    ks = jax.random.split(key, 4)
    f32 = jnp.float32
    return {
        "lin_w": 0.02 * jax.random.normal(ks[0], (4 * 4 * 512, 100 + num_classes), f32),
        "lin_b": jnp.zeros((4 * 4 * 512,), f32),
        "bn1_g": jnp.ones((512,), f32), "bn1_b": jnp.zeros((512,), f32),
        "w2": 0.02 * jax.random.normal(ks[1], (512 + num_classes, 256, 4, 4), f32),
        "bn2_g": jnp.ones((256,), f32), "bn2_b": jnp.zeros((256,), f32),
        "w3": 0.02 * jax.random.normal(ks[2], (256 + num_classes, 128, 4, 4), f32),
        "bn3_g": jnp.ones((128,), f32), "bn3_b": jnp.zeros((128,), f32),
        "w4": 0.02 * jax.random.normal(ks[3], (128 + num_classes, 3, 4, 4), f32),
    }


def _pack_convT_split(w, c_in_x):
    """(Cin_total, Cout, 4, 4) torch ConvTranspose2d layout ->
    W_x: (c_in_x, Np) bf16 and W_y (label rows): (Cin_total-c_in_x, Np) f32,
    columns tap-major (kh, kw, cout), zero-padded to a multiple of 128."""
    c_out = w.shape[1]
    n = 16 * c_out
    np_ = _round_up(n, 128)
    flat = jnp.transpose(w, (0, 2, 3, 1)).reshape(w.shape[0], n)
    if np_ != n:
        flat = jnp.pad(flat, ((0, 0), (0, np_ - n)))
    return flat[:c_in_x].astype(jnp.bfloat16), flat[c_in_x:].astype(jnp.float32)


def pack_params(p, num_classes):
    """One-time packing: transposes, tap-flattening, NHWC column permutation,
    K padding and bf16 casts hoisted out of the steady-state forward graph."""
    cin = 100 + num_classes
    lw = jnp.transpose(p["lin_w"].reshape(512, 4, 4, cin),
                       (3, 1, 2, 0)).reshape(cin, 4 * 4 * 512)   # (110, 8192) NHWC cols
    lw = jnp.pad(lw, ((0, 128 - cin), (0, 0))).astype(jnp.bfloat16)
    lb = jnp.transpose(p["lin_b"].reshape(512, 4, 4),
                       (1, 2, 0)).reshape(1, 4 * 4 * 512).astype(jnp.float32)
    w2x, w2y = _pack_convT_split(p["w2"], 512)
    w3x, w3y = _pack_convT_split(p["w3"], 256)
    w4x, w4y = _pack_convT_split(p["w4"], 128)
    return {
        "lin_w_t": lw, "lin_b": lb,
        "bn1_g": p["bn1_g"], "bn1_b": p["bn1_b"],
        "bn2_g": p["bn2_g"], "bn2_b": p["bn2_b"],
        "bn3_g": p["bn3_g"], "bn3_b": p["bn3_b"],
        "w2_xp": w2x, "w2_yp": w2y,
        "w3_xp": w3x, "w3_yp": w3y,
        "w4_xp": w4x, "w4_yp": w4y,
    }


# ----------------------------------------------------------------------------
# Reference (for the fused conv-block self-check)
# ----------------------------------------------------------------------------
def _ref_conv_transpose_s2k4p1(x_nhwc, w_torch):
    """ConvTranspose2d(k=4, s=2, p=1) via lax.conv_general_dilated."""
    w_flip = w_torch[:, :, ::-1, ::-1]
    w_hwio = jnp.transpose(w_flip, (2, 3, 0, 1))
    return jax.lax.conv_general_dilated(
        x_nhwc, w_hwio, window_strides=(1, 1),
        padding=((2, 2), (2, 2)), lhs_dilation=(2, 2),
        dimension_numbers=("NHWC", "HWIO", "NHWC"),
        precision=jax.lax.Precision.HIGHEST)


if __name__ == "__main__":
    num_classes = 10        # required for the 522/266/138 channel counts
    batch = 2
    key = jax.random.PRNGKey(0)
    k_params, k_z, k_chk = jax.random.split(key, 3)

    params = init_params(k_params, num_classes)
    packed = pack_params(params, num_classes)

    z = jax.random.normal(k_z, (batch, 100), jnp.float32)
    labels = jnp.arange(batch) % num_classes
    gen_y = jax.nn.one_hot(labels, num_classes, dtype=jnp.float32)

    # --- self-check: one full fused conv block (BN batch stats + ReLU +
    # label-bias matmul + col2im) against lax.conv of the concat formulation.
    # Tolerance accounts for bf16 rounding of the matmul output / weights.
    Ck, Hk, Wk = 128, 16, 16
    xc = jax.random.normal(k_chk, (batch, Hk, Wk, Ck), jnp.float32).astype(jnp.bfloat16)
    g_chk = 1.0 + 0.1 * jax.random.normal(jax.random.PRNGKey(1), (Ck,), jnp.float32)
    b_chk = 0.1 * jax.random.normal(jax.random.PRNGKey(2), (Ck,), jnp.float32)
    mine = conv_block(xc, g_chk, b_chk, packed["w4_xp"], packed["w4_yp"], gen_y, 3)

    x32 = xc.astype(jnp.float32)
    mean = x32.reshape(-1, Ck).mean(0)
    var = x32.reshape(-1, Ck).var(0)
    xa = jnp.maximum((x32 - mean) * jax.lax.rsqrt(var + 1e-5) * g_chk + b_chk, 0.0)
    xa = xa.astype(jnp.bfloat16).astype(jnp.float32)
    ymap = jnp.broadcast_to(gen_y[:, None, None, :], (batch, Hk, Wk, num_classes))
    xin = jnp.concatenate([xa, ymap], axis=-1)
    w4_bf = params["w4"].astype(jnp.bfloat16).astype(jnp.float32)
    ref = _ref_conv_transpose_s2k4p1(xin, w4_bf)
    err = float(jnp.max(jnp.abs(mine.astype(jnp.float32) - ref)))
    mag = float(jnp.max(jnp.abs(ref)))
    assert err <= 3e-2 * mag + 1e-3, ("conv block mismatch", err, mag)

    # --- full forward
    fwd = jax.jit(generator_forward)
    out = fwd(z, gen_y, packed)
    out = jax.block_until_ready(out)
    assert out.shape == (batch, 3, 32, 32), out.shape
    assert bool(jnp.all(jnp.isfinite(out)))
    print("KERNEL_OK")
</pallas_src>

<mosaic_0001>
module attributes {stable_mosaic.version = 11 : i64} {
  func.func @_bn_stats_kernel(%arg0: i32, %arg1: memref<512x128xbf16, #tpu.memory_space<vmem>>, %arg2: memref<1x128xf32, #tpu.memory_space<vmem>>, %arg3: memref<1x128xf32, #tpu.memory_space<vmem>>, %arg4: memref<1x128xf32, #tpu.memory_space<vmem>>, %arg5: memref<1x128xf32, #tpu.memory_space<vmem>>, %arg6: memref<1x128xf32, #tpu.memory_space<vmem>>, %arg7: memref<1x128xf32, #tpu.memory_space<vmem>>, %arg8: memref<1x128xf32, #tpu.memory_space<vmem>>) attributes {dimension_semantics = [#tpu.dimension_semantics<arbitrary>], iteration_bounds = array<i64: 1>, scalar_prefetch = 0 : i64, scratch_operands = 3 : i64, tpu.core_type = #tpu.core_type<tc>, window_params = [{transform_indices = @transform_0, window_bounds = array<i64: 512, 128>}, {pipeline_mode = #tpu.pipeline_mode<synchronous>, transform_indices = @transform_1, window_bounds = array<i64: 1, 128>}, {pipeline_mode = #tpu.pipeline_mode<synchronous>, transform_indices = @transform_2, window_bounds = array<i64: 1, 128>}, {pipeline_mode = #tpu.pipeline_mode<synchronous>, transform_indices = @transform_3, window_bounds = array<i64: 1, 128>}, {pipeline_mode = #tpu.pipeline_mode<synchronous>, transform_indices = @transform_4, window_bounds = array<i64: 1, 128>}]} {
    %c0 = arith.constant 0 : index
    %c0_0 = arith.constant 0 : index
    %0 = vector.load %arg1[%c0, %c0_0] : memref<512x128xbf16, #tpu.memory_space<vmem>>, vector<512x128xbf16>
    %1 = arith.extf %0 : vector<512x128xbf16> to vector<512x128xf32>
    %c0_i32 = arith.constant 0 : i32
    %2 = arith.cmpi eq, %arg0, %c0_i32 : i32
    %3 = arith.extui %2 : i1 to i32
    %c0_i32_1 = arith.constant 0 : i32
    %4 = arith.cmpi ne, %3, %c0_i32_1 : i32
    scf.if %4 {
      %22 = vector.extract_strided_slice %1 {offsets = [0, 0], sizes = [1, 128], strides = [1, 1]} : vector<512x128xf32> to vector<1x128xf32>
      %c0_15 = arith.constant 0 : index
      %c0_16 = arith.constant 0 : index
      %23 = vector.load %arg6[%c0_15, %c0_16] : memref<1x128xf32, #tpu.memory_space<vmem>>, vector<1x128xf32>
      tpu.vector_store %arg6[%c0_15, %c0_16], %22 {strides = array<i32>} : memref<1x128xf32, #tpu.memory_space<vmem>>, vector<1x128xf32>,
      %cst_17 = arith.constant 0.000000e+00 : f32
      %24 = vector.broadcast %cst_17 : f32 to vector<1x128xf32>
      %c0_18 = arith.constant 0 : index
      %c0_19 = arith.constant 0 : index
      %25 = vector.load %arg7[%c0_18, %c0_19] : memref<1x128xf32, #tpu.memory_space<vmem>>, vector<1x128xf32>
      tpu.vector_store %arg7[%c0_18, %c0_19], %24 {strides = array<i32>} : memref<1x128xf32, #tpu.memory_space<vmem>>, vector<1x128xf32>,
      %cst_20 = arith.constant 0.000000e+00 : f32
      %26 = vector.broadcast %cst_20 : f32 to vector<1x128xf32>
      %c0_21 = arith.constant 0 : index
      %c0_22 = arith.constant 0 : index
      %27 = vector.load %arg8[%c0_21, %c0_22] : memref<1x128xf32, #tpu.memory_space<vmem>>, vector<1x128xf32>
      tpu.vector_store %arg8[%c0_21, %c0_22], %26 {strides = array<i32>} : memref<1x128xf32, #tpu.memory_space<vmem>>, vector<1x128xf32>,
    } else {
    }
    %c0_2 = arith.constant 0 : index
    %c0_3 = arith.constant 0 : index
    %5 = vector.load %arg6[%c0_2, %c0_3] : memref<1x128xf32, #tpu.memory_space<vmem>>, vector<1x128xf32>
    %6 = vector.broadcast %5 : vector<1x128xf32> to vector<512x128xf32>
    %7 = arith.subf %1, %6 : vector<512x128xf32>
    %c0_4 = arith.constant 0 : index
    %c0_5 = arith.constant 0 : index
    %8 = vector.load %arg7[%c0_4, %c0_5] : memref<1x128xf32, #tpu.memory_space<vmem>>, vector<1x128xf32>
    %cst = arith.constant dense<0.000000e+00> : vector<128xf32>
    %9 = vector.multi_reduction <add>, %7, %cst [0] : vector<512x128xf32> to vector<128xf32>
    %10 = vector.shape_cast %9 : vector<128xf32> to vector<1x128xf32>
    %11 = arith.addf %8, %10 : vector<1x128xf32>
    %c0_6 = arith.constant 0 : index
    %c0_7 = arith.constant 0 : index
    %12 = vector.load %arg7[%c0_6, %c0_7] : memref<1x128xf32, #tpu.memory_space<vmem>>, vector<1x128xf32>
    tpu.vector_store %arg7[%c0_6, %c0_7], %11 {strides = array<i32>} : memref<1x128xf32, #tpu.memory_space<vmem>>, vector<1x128xf32>,
    %c0_8 = arith.constant 0 : index
    %c0_9 = arith.constant 0 : index
    %13 = vector.load %arg8[%c0_8, %c0_9] : memref<1x128xf32, #tpu.memory_space<vmem>>, vector<1x128xf32>
    %14 = arith.mulf %7, %7 : vector<512x128xf32>
    %cst_10 = arith.constant dense<0.000000e+00> : vector<128xf32>
    %15 = vector.multi_reduction <add>, %14, %cst_10 [0] : vector<512x128xf32> to vector<128xf32>
    %16 = vector.shape_cast %15 : vector<128xf32> to vector<1x128xf32>
    %17 = arith.addf %13, %16 : vector<1x128xf32>
    %c0_11 = arith.constant 0 : index
    %c0_12 = arith.constant 0 : index
    %18 = vector.load %arg8[%c0_11, %c0_12] : memref<1x128xf32, #tpu.memory_space<vmem>>, vector<1x128xf32>
    tpu.vector_store %arg8[%c0_11, %c0_12], %17 {strides = array<i32>} : memref<1x128xf32, #tpu.memory_space<vmem>>, vector<1x128xf32>,
    %c0_i32_13 = arith.constant 0 : i32
    %19 = arith.cmpi eq, %arg0, %c0_i32_13 : i32
    %20 = arith.extui %19 : i1 to i32
    %c0_i32_14 = arith.constant 0 : i32
    %21 = arith.cmpi ne, %20, %c0_i32_14 : i32
    scf.if %21 {
      %c0_15 = arith.constant 0 : index
      %c0_16 = arith.constant 0 : index
      %22 = vector.load %arg7[%c0_15, %c0_16] : memref<1x128xf32, #tpu.memory_space<vmem>>, vector<1x128xf32>
      %cst_17 = arith.constant 0.001953125 : f32
      %23 = vector.broadcast %cst_17 : f32 to vector<1x128xf32>
      %24 = arith.mulf %22, %23 : vector<1x128xf32>
      %c0_18 = arith.constant 0 : index
      %c0_19 = arith.constant 0 : index
      %25 = vector.load %arg8[%c0_18, %c0_19] : memref<1x128xf32, #tpu.memory_space<vmem>>, vector<1x128xf32>
      %cst_20 = arith.constant 0.001953125 : f32
      %26 = vector.broadcast %cst_20 : f32 to vector<1x128xf32>
      %27 = arith.mulf %25, %26 : vector<1x128xf32>
      %28 = arith.mulf %24, %24 : vector<1x128xf32>
      %29 = arith.subf %27, %28 : vector<1x128xf32>
      %cst_21 = arith.constant 0.000000e+00 : f32
      %30 = vector.broadcast %cst_21 : f32 to vector<1x128xf32>
      %31 = arith.maximumf %29, %30 : vector<1x128xf32>
      %c0_22 = arith.constant 0 : index
      %c0_23 = arith.constant 0 : index
      %32 = vector.load %arg6[%c0_22, %c0_23] : memref<1x128xf32, #tpu.memory_space<vmem>>, vector<1x128xf32>
      %33 = arith.addf %24, %32 : vector<1x128xf32>
      %c0_24 = arith.constant 0 : index
      %c0_25 = arith.constant 0 : index
      %34 = vector.load %arg2[%c0_24, %c0_25] : memref<1x128xf32, #tpu.memory_space<vmem>>, vector<1x128xf32>
      %cst_26 = arith.constant 9.99999974E-6 : f32
      %35 = vector.broadcast %cst_26 : f32 to vector<1x128xf32>
      %36 = arith.addf %31, %35 : vector<1x128xf32>
      %37 = math.rsqrt %36 : vector<1x128xf32>
      %38 = arith.mulf %34, %37 : vector<1x128xf32>
      %c0_27 = arith.constant 0 : index
      %c0_28 = arith.constant 0 : index
      %39 = vector.load %arg4[%c0_27, %c0_28] : memref<1x128xf32, #tpu.memory_space<vmem>>, vector<1x128xf32>
      tpu.vector_store %arg4[%c0_27, %c0_28], %38 {strides = array<i32>} : memref<1x128xf32, #tpu.memory_space<vmem>>, vector<1x128xf32>,
      %c0_29 = arith.constant 0 : index
      %c0_30 = arith.constant 0 : index
      %40 = vector.load %arg3[%c0_29, %c0_30] : memref<1x128xf32, #tpu.memory_space<vmem>>, vector<1x128xf32>
      %41 = arith.mulf %33, %38 : vector<1x128xf32>
      %42 = arith.subf %40, %41 : vector<1x128xf32>
      %c0_31 = arith.constant 0 : index
      %c0_32 = arith.constant 0 : index
      %43 = vector.load %arg5[%c0_31, %c0_32] : memref<1x128xf32, #tpu.memory_space<vmem>>, vector<1x128xf32>
      tpu.vector_store %arg5[%c0_31, %c0_32], %42 {strides = array<i32>} : memref<1x128xf32, #tpu.memory_space<vmem>>, vector<1x128xf32>,
    } else {
    }
    return
  }
  func.func @transform_0(%arg0: i32) -> (i32, i32) {
    %c0_i32 = arith.constant 0 : i32
    %c0_i32_0 = arith.constant 0 : i32
    return %arg0, %c0_i32 : i32, i32
  }
  func.func @transform_1(%arg0: i32) -> (i32, i32) {
    %c0_i32 = arith.constant 0 : i32
    %c0_i32_0 = arith.constant 0 : i32
    %c0_i32_1 = arith.constant 0 : i32
    return %c0_i32, %c0_i32_0 : i32, i32
  }
  func.func @transform_2(%arg0: i32) -> (i32, i32) {
    %c0_i32 = arith.constant 0 : i32
    %c0_i32_0 = arith.constant 0 : i32
    %c0_i32_1 = arith.constant 0 : i32
    return %c0_i32, %c0_i32_0 : i32, i32
  }
  func.func @transform_3(%arg0: i32) -> (i32, i32) {
    %c0_i32 = arith.constant 0 : i32
    %c0_i32_0 = arith.constant 0 : i32
    %c0_i32_1 = arith.constant 0 : i32
    return %c0_i32, %c0_i32_0 : i32, i32
  }
  func.func @transform_4(%arg0: i32) -> (i32, i32) {
    %c0_i32 = arith.constant 0 : i32
    %c0_i32_0 = arith.constant 0 : i32
    %c0_i32_1 = arith.constant 0 : i32
    return %c0_i32, %c0_i32_0 : i32, i32
  }
}

</mosaic_0001>

<bundles_post_ra>
// kernel: tpu_custom_call.1
= control target key start
LH: loop header
LB: loop body
LE: loop exit
PB: predicated region body
PF: predicated region fallthrough
CT: control target
= control target key end

     0   :  { %10 = vsyncpa [#allocation6], 0  ;;  %s875_s0 = inlined_call_operand.hbm [shape: bf16[512,128], index: 0, kind: input, shape index: {}]   ;;  %s876_s1 = inlined_call_operand.vmem [shape: f32[1,128], index: 1, kind: input, shape index: {}]   ;;  %s877_s2 = inlined_call_operand.vmem [shape: f32[1,128], index: 2, kind: input, shape index: {}]   ;;  %s878_s3 = inlined_call_operand.hbm [shape: f32[1,128], index: 3, kind: output, shape index: {0}]   ;;  %s879_s4 = inlined_call_operand.hbm [shape: f32[1,128], index: 4, kind: output, shape index: {1}]  }
   0x1   :  { %11 = vsyncpa [#allocation7], 0 }
   0x2   :  { %12 = vsyncpa [#allocation10], 0  ;;  %s736_s15 = smov [#allocation5]   ;;  %s664_s19 = scalar_lea.hbm %s875_s0, 4096 }
   0x3   :  { %s18_s16 = sshll.u32 %s736_s15, 4  ;;  %p665_p0 = scmp.ne.s32.totalorder %s875_s0, %s664_s19  ;;  %s19_s16 = int_to_ptr.vmem [resolvable:$true] %s18_s16 }
   0x4   :  { %p668_p1 = scmp.lt.u32.totalorder %s664_s19, %s875_s0 }
   0x6   :  { %p670_p2 = pnand %p668_p1, %p665_p0 }
   0x8   :  { %673 = shalt.err (!%p670_p2)
}
   0x9   :  { %s674_s24 = scalar_lea.vmem %s19_s16, 4096  ;;  %p679_p4 = scmp.lt.s32.totalorder %s19_s16, %s19_s16 }
   0xa   :  { %p675_p3 = scmp.ne.s32.totalorder %s19_s16, %s674_s24  ;;  %p680_p5 = scmp.lt.s32.totalorder %s674_s24, %s674_s24 }
   0xc   :  { %p681_p6 = por %p680_p5, %p679_p4 }
   0xe   :  { %p682_p7 = pnand %p681_p6, %p675_p3 }
  0x10   :  { %685 = shalt.err (!%p682_p7)
}
  0x11   :  { %s737_s25 = smov 64   ;;  %s738_s26 = smov 4  }
  0x12   :  { %24 = dma.hbm_to_vmem [thread:$0]  %s875_s0, 4096, %s19_s16, [#allocation6], %s737_s25, %s737_s25, %s738_s26  }
  0x13   :  { %730 = dma.done.wait [#allocation6], 4096  }
  0x14   :  { %731 = vsyncadd [#allocation6], 4294963200  ;;  %v739_v0 = vmov 0.0   ;;  %v498_v1 = vld [vmem:[#allocation5] sm:$0xff]   ;;  %v625_v4 = vld [vmem:[#allocation5 + $0x8] sm:$0xff]   ;;  %s740_s30 = smov [#allocation8]  }
  0x15   :  { %165 = vst [vmem:[#allocation3] sm:$0x1] %v739_v0  ;;  %166 = vst [vmem:[#allocation4] sm:$0x1] %v739_v0  ;;  %v499_v2 = vunpack.c.l.bf16 %v498_v1  ;;  %v500_v3 = vunpack.c.h.bf16 %v498_v1  ;;  %v503_v6 = vunpack.c.l.bf16 %v625_v4  ;;  %v626_v9 = vld [vmem:[#allocation5 + $0x10] sm:$0xff]   ;;  %v504_v10 = vunpack.c.h.bf16 %v625_v4  ;;  %v627_v14 = vld [vmem:[#allocation5 + $0x18] sm:$0xff]  }
  0x16   :  { %v507_v11 = vunpack.c.l.bf16 %v626_v9  ;;  %v508_v15 = vunpack.c.h.bf16 %v626_v9  ;;  %v511_v18 = vunpack.c.l.bf16 %v627_v14  ;;  %v512_v21 = vunpack.c.h.bf16 %v627_v14  ;;  %v628_v22 = vld [vmem:[#allocation5 + $0x20] sm:$0xff]   ;;  %v629_v28 = vld [vmem:[#allocation5 + $0x28] sm:$0xff]   ;;  %v630_v37 = vld [vmem:[#allocation5 + $0x30] sm:$0xff]   ;;  %s473_s5 = sshll.u32 %s740_s30, 4  ;;  %s741_s8 = smov [#allocation9]   ;;  %s474_s5 = int_to_ptr.vmem [resolvable:$true] %s473_s5 }
  0x17   :  { %164 = vst [vmem:[#allocation2] sm:$0x1] %v499_v2  ;;  %v515_v27 = vunpack.c.l.bf16 %v628_v22  ;;  %v516_v31 = vunpack.c.h.bf16 %v628_v22  ;;  %v519_v36 = vunpack.c.l.bf16 %v629_v28  ;;  %v520_v42 = vunpack.c.h.bf16 %v629_v28  ;;  %v631_v48 = vld [vmem:[#allocation5 + $0x38] sm:$0xff]   ;;  %v632_v59 = vld [vmem:[#allocation5 + $0x40] sm:$0xff]   ;;  %s483_s9 = sshll.u32 %s741_s8, 4  ;;  %s686_s10 = scalar_lea.vmem %s474_s5, 16  ;;  %s484_s9 = int_to_ptr.vmem [resolvable:$true] %s483_s9 }
  0x18   :  { %v523_v47 = vunpack.c.l.bf16 %v630_v37  ;;  %v524_v53 = vunpack.c.h.bf16 %v630_v37  ;;  %v527_v58 = vunpack.c.l.bf16 %v631_v48  ;;  %v528_v0 = vunpack.c.h.bf16 %v631_v48  ;;  %p687_p8 = scmp.ne.s32.totalorder %s474_s5, %s686_s10  ;;  %s690_s11 = scalar_lea.vmem %s474_s5, 32 }
  0x19   :  { %p691_p9 = scmp.lt.s32.totalorder %s474_s5, %s474_s5  ;;  %p692_p10 = scmp.lt.s32.totalorder %s690_s11, %s686_s10 }
  0x1b   :  { %p693_p11 = por %p692_p10, %p691_p9 }
  0x1d   :  { %p694_p12 = pnand %p693_p11, %p687_p8 }
  0x1e   :  { %v779_v5 = vld [vmem:[#allocation2] ss:$0 sm:$0xff] }
  0x1f   :  { %v174_v7 = vsub.f32 %v499_v2, %v779_v5  ;;  %v175_v8 = vsub.f32 %v500_v3, %v779_v5  ;;  %v176_v12 = vsub.f32 %v503_v6, %v779_v5  ;;  %v177_v16 = vsub.f32 %v504_v10, %v779_v5 }
  0x20   :  { %v178_v19 = vsub.f32 %v507_v11, %v779_v5  ;;  %v179_v23 = vsub.f32 %v508_v15, %v779_v5  ;;  %v180_v29 = vsub.f32 %v511_v18, %v779_v5  ;;  %v181_v32 = vsub.f32 %v512_v21, %v779_v5  ;;  %v634_v18 = vld [vmem:[#allocation5 + $0x50] sm:$0xff]  }
  0x21   :  { %v239_v13 = vadd.f32 %v175_v8, %v174_v7  ;;  %v311_v25 = vmul.f32 %v174_v7, %v174_v7  ;;  %v312_v26 = vmul.f32 %v175_v8, %v175_v8  ;;  %v313_v34 = vmul.f32 %v176_v12, %v176_v12  ;;  %v633_v7 = vld [vmem:[#allocation5 + $0x48] sm:$0xff]  }
  0x22   :  { %v182_v38 = vsub.f32 %v515_v27, %v779_v5  ;;  %v314_v40 = vmul.f32 %v177_v16, %v177_v16  ;;  %v183_v43 = vsub.f32 %v516_v31, %v779_v5  ;;  %v315_v45 = vmul.f32 %v178_v19, %v178_v19 }
  0x23   :  { %v240_v17 = vadd.f32 %v239_v13, %v176_v12  ;;  %v375_v35 = vadd.f32 %v312_v26, %v311_v25  ;;  %v184_v49 = vsub.f32 %v519_v36, %v779_v5  ;;  %v316_v51 = vmul.f32 %v179_v23, %v179_v23 }
  0x24   :  { %v185_v54 = vsub.f32 %v520_v42, %v779_v5  ;;  %v317_v56 = vmul.f32 %v180_v29, %v180_v29  ;;  %v186_v60 = vsub.f32 %v523_v47, %v779_v5  ;;  %v318_v62 = vmul.f32 %v181_v32, %v181_v32 }
  0x25   :  { %v241_v20 = vadd.f32 %v240_v17, %v177_v16  ;;  %v376_v41 = vadd.f32 %v375_v35, %v313_v34  ;;  %v187_v1 = vsub.f32 %v524_v53, %v779_v5  ;;  %v319_v3 = vmul.f32 %v182_v38, %v182_v38 }
  0x26   :  { %v531_v6 = vunpack.c.l.bf16 %v632_v59  ;;  %v188_v8 = vsub.f32 %v527_v58, %v779_v5  ;;  %v320_v10 = vmul.f32 %v183_v43, %v183_v43  ;;  %v532_v12 = vunpack.c.h.bf16 %v632_v59 }
  0x27   :  { %v242_v24 = vadd.f32 %v241_v20, %v178_v19  ;;  %v377_v46 = vadd.f32 %v376_v41, %v314_v40  ;;  %v189_v13 = vsub.f32 %v528_v0, %v779_v5  ;;  %v321_v15 = vmul.f32 %v184_v49, %v184_v49  ;;  %v636_v40 = vld [vmem:[#allocation5 + $0x60] sm:$0xff]  }
  0x28   :  { %v535_v17 = vunpack.c.l.bf16 %v633_v7  ;;  %v190_v19 = vsub.f32 %v531_v6, %v779_v5  ;;  %v322_v21 = vmul.f32 %v185_v54, %v185_v54  ;;  %v323_v26 = vmul.f32 %v186_v60, %v186_v60 }
  0x29   :  { %v243_v30 = vadd.f32 %v242_v24, %v179_v23  ;;  %v378_v52 = vadd.f32 %v377_v46, %v315_v45  ;;  %v536_v23 = vunpack.c.h.bf16 %v633_v7  ;;  %v191_v24 = vsub.f32 %v532_v12, %v779_v5 }
  0x2a   :  { %v539_v28 = vunpack.c.l.bf16 %v634_v18  ;;  %v540_v34 = vunpack.c.h.bf16 %v634_v18  ;;  %v325_v37 = vmul.f32 %v188_v8, %v188_v8  ;;  %v327_v48 = vmul.f32 %v190_v19, %v190_v19 }
  0x2b   :  { %v244_v33 = vadd.f32 %v243_v30, %v180_v29  ;;  %v379_v57 = vadd.f32 %v378_v52, %v316_v51  ;;  %v635_v29 = vld [vmem:[#allocation5 + $0x58] sm:$0xff]   ;;  %v192_v30 = vsub.f32 %v535_v17, %v779_v5  ;;  %v193_v35 = vsub.f32 %v536_v23, %v779_v5  ;;  %v637_v51 = vld [vmem:[#allocation5 + $0x68] sm:$0xff]  }
  0x2c   :  { %v194_v41 = vsub.f32 %v539_v28, %v779_v5  ;;  %v544_v45 = vunpack.c.h.bf16 %v635_v29  ;;  %v195_v46 = vsub.f32 %v540_v34, %v779_v5 }
  0x2d   :  { %v245_v39 = vadd.f32 %v244_v33, %v181_v32  ;;  %v380_v63 = vadd.f32 %v379_v57, %v317_v56  ;;  %v324_v32 = vmul.f32 %v187_v1, %v187_v1  ;;  %v548_v56 = vunpack.c.h.bf16 %v636_v40 }
  0x2e   :  { %v197_v57 = vsub.f32 %v544_v45, %v779_v5  ;;  %v329_v59 = vmul.f32 %v192_v30, %v192_v30  ;;  %v331_v7 = vmul.f32 %v194_v41, %v194_v41 }
  0x2f   :  { %v246_v44 = vadd.f32 %v245_v39, %v182_v38  ;;  %v381_v4 = vadd.f32 %v380_v63, %v318_v62  ;;  %v543_v39 = vunpack.c.l.bf16 %v635_v29  ;;  %v638_v62 = vld [vmem:[#allocation5 + $0x70] sm:$0xff]  }
  0x31   :  { %v247_v50 = vadd.f32 %v246_v44, %v183_v43  ;;  %v382_v11 = vadd.f32 %v381_v4, %v319_v3  ;;  %v326_v43 = vmul.f32 %v189_v13, %v189_v13  ;;  %v196_v52 = vsub.f32 %v543_v39, %v779_v5 }
  0x32   :  { %v552_v3 = vunpack.c.h.bf16 %v637_v51  ;;  %v199_v4 = vsub.f32 %v548_v56, %v779_v5 }
  0x33   :  { %v248_v55 = vadd.f32 %v247_v50, %v184_v49  ;;  %v383_v16 = vadd.f32 %v382_v11, %v320_v10  ;;  %v547_v50 = vunpack.c.l.bf16 %v636_v40  ;;  %v639_v10 = vld [vmem:[#allocation5 + $0x78] sm:$0xff]   ;;  %v333_v18 = vmul.f32 %v196_v52, %v196_v52 }
  0x34   :  { %v336_v34 = vmul.f32 %v199_v4, %v199_v4 }
  0x35   :  { %v249_v61 = vadd.f32 %v248_v55, %v185_v54  ;;  %v384_v22 = vadd.f32 %v383_v16, %v321_v15  ;;  %v328_v54 = vmul.f32 %v191_v24, %v191_v24  ;;  %v198_v63 = vsub.f32 %v547_v50, %v779_v5 }
  0x36   :  { %v556_v15 = vunpack.c.h.bf16 %v638_v62  ;;  %v201_v16 = vsub.f32 %v552_v3, %v779_v5 }
  0x37   :  { %v250_v2 = vadd.f32 %v249_v61, %v186_v60  ;;  %v385_v27 = vadd.f32 %v384_v22, %v322_v21  ;;  %v551_v61 = vunpack.c.l.bf16 %v637_v51  ;;  %v640_v21 = vld [vmem:[#allocation5 + $0x80] sm:$0xff]   ;;  %v335_v29 = vmul.f32 %v198_v63, %v198_v63 }
  0x38   :  { %v338_v45 = vmul.f32 %v201_v16, %v201_v16 }
  0x39   :  { %v251_v9 = vadd.f32 %v250_v2, %v187_v1  ;;  %v386_v33 = vadd.f32 %v385_v27, %v323_v26  ;;  %v330_v1 = vmul.f32 %v193_v35, %v193_v35  ;;  %v200_v11 = vsub.f32 %v551_v61, %v779_v5 }
  0x3a   :  { %v560_v26 = vunpack.c.h.bf16 %v639_v10  ;;  %v203_v27 = vsub.f32 %v556_v15, %v779_v5  ;;  %v645_v15 = vld [vmem:[#allocation5 + $0xa8] sm:$0xff]  }
  0x3b   :  { %v252_v14 = vadd.f32 %v251_v9, %v188_v8  ;;  %v387_v38 = vadd.f32 %v386_v33, %v324_v32  ;;  %v555_v9 = vunpack.c.l.bf16 %v638_v62  ;;  %v337_v40 = vmul.f32 %v200_v11, %v200_v11 }
  0x3d   :  { %v253_v20 = vadd.f32 %v252_v14, %v189_v13  ;;  %v388_v44 = vadd.f32 %v387_v38, %v325_v37  ;;  %v332_v13 = vmul.f32 %v195_v46, %v195_v46  ;;  %v202_v22 = vsub.f32 %v555_v9, %v779_v5 }
  0x3e   :  { %v564_v37 = vunpack.c.h.bf16 %v640_v21  ;;  %v205_v38 = vsub.f32 %v560_v26, %v779_v5 }
  0x3f   :  { %v254_v25 = vadd.f32 %v253_v20, %v190_v19  ;;  %v389_v49 = vadd.f32 %v388_v44, %v326_v43  ;;  %v559_v20 = vunpack.c.l.bf16 %v639_v10  ;;  %v339_v51 = vmul.f32 %v202_v22, %v202_v22 }
  0x41   :  { %v255_v31 = vadd.f32 %v254_v25, %v191_v24  ;;  %v390_v55 = vadd.f32 %v389_v49, %v327_v48  ;;  %v334_v24 = vmul.f32 %v197_v57, %v197_v57  ;;  %v204_v32 = vsub.f32 %v559_v20, %v779_v5 }
  0x42   :  { %v207_v49 = vsub.f32 %v564_v37, %v779_v5 }
  0x43   :  { %v256_v36 = vadd.f32 %v255_v31, %v192_v30  ;;  %v391_v60 = vadd.f32 %v390_v55, %v328_v54  ;;  %v563_v31 = vunpack.c.l.bf16 %v640_v21  ;;  %v340_v55 = vmul.f32 %v203_v27, %v203_v27 }
  0x45   :  { %v257_v42 = vadd.f32 %v256_v36, %v193_v35  ;;  %v392_v2 = vadd.f32 %v391_v60, %v329_v59  ;;  %v641_v36 = vld [vmem:[#allocation5 + $0x88] sm:$0xff]   ;;  %v206_v43 = vsub.f32 %v563_v31, %v779_v5  ;;  %v341_v60 = vmul.f32 %v204_v32, %v204_v32 }
  0x46   :  { %v568_v48 = vunpack.c.h.bf16 %v641_v36 }
  0x47   :  { %v258_v47 = vadd.f32 %v257_v42, %v194_v41  ;;  %v393_v8 = vadd.f32 %v392_v2, %v330_v1  ;;  %v567_v42 = vunpack.c.l.bf16 %v641_v36  ;;  %v342_v1 = vmul.f32 %v205_v38, %v205_v38 }
  0x48   :  { %v209_v62 = vsub.f32 %v568_v48, %v779_v5 }
  0x49   :  { %v259_v53 = vadd.f32 %v258_v47, %v195_v46  ;;  %v394_v14 = vadd.f32 %v393_v8, %v331_v7  ;;  %v642_v47 = vld [vmem:[#allocation5 + $0x90] sm:$0xff]   ;;  %v644_v7 = vld [vmem:[#allocation5 + $0xa0] sm:$0xff]   ;;  %v343_v8 = vmul.f32 %v206_v43, %v206_v43 }
  0x4a   :  { %v572_v59 = vunpack.c.h.bf16 %v642_v47 }
  0x4b   :  { %v260_v58 = vadd.f32 %v259_v53, %v196_v52  ;;  %v395_v19 = vadd.f32 %v394_v14, %v332_v13  ;;  %v571_v53 = vunpack.c.l.bf16 %v642_v47  ;;  %v579_v14 = vunpack.c.l.bf16 %v644_v7 }
  0x4c   :  { %v211_v10 = vsub.f32 %v572_v59, %v779_v5 }
  0x4d   :  { %v261_v0 = vadd.f32 %v260_v58, %v197_v57  ;;  %v396_v25 = vadd.f32 %v395_v19, %v333_v18  ;;  %v643_v57 = vld [vmem:[#allocation5 + $0x98] sm:$0xff]   ;;  %v208_v58 = vsub.f32 %v567_v42, %v779_v5  ;;  %v210_v3 = vsub.f32 %v571_v53, %v779_v5 }
  0x4e   :  { %v580_v18 = vunpack.c.h.bf16 %v644_v7 }
  0x4f   :  { %v262_v6 = vadd.f32 %v261_v0, %v198_v63  ;;  %v397_v30 = vadd.f32 %v396_v25, %v334_v24  ;;  %v575_v0 = vunpack.c.l.bf16 %v643_v57  ;;  %v646_v24 = vld [vmem:[#allocation5 + $0xb0] sm:$0xff]   ;;  %v214_v25 = vsub.f32 %v579_v14, %v779_v5 }
  0x51   :  { %v263_v12 = vadd.f32 %v262_v6, %v199_v4  ;;  %v398_v35 = vadd.f32 %v397_v30, %v335_v29  ;;  %v576_v6 = vunpack.c.h.bf16 %v643_v57  ;;  %v584_v29 = vunpack.c.h.bf16 %v645_v15  ;;  %v649_v57 = vld [vmem:[#allocation5 + $0xc8] sm:$0xff]  }
  0x52   :  { %v215_v30 = vsub.f32 %v580_v18, %v779_v5 }
  0x53   :  { %v264_v17 = vadd.f32 %v263_v12, %v200_v11  ;;  %v399_v41 = vadd.f32 %v398_v35, %v336_v34  ;;  %v344_v12 = vmul.f32 %v207_v49, %v207_v49  ;;  %v213_v20 = vsub.f32 %v576_v6, %v779_v5  ;;  %v647_v35 = vld [vmem:[#allocation5 + $0xb8] sm:$0xff]  }
  0x54   :  { %v587_v34 = vunpack.c.l.bf16 %v646_v24 }
  0x55   :  { %v265_v23 = vadd.f32 %v264_v17, %v201_v16  ;;  %v400_v46 = vadd.f32 %v399_v41, %v337_v40  ;;  %v212_v16 = vsub.f32 %v575_v0, %v779_v5  ;;  %v588_v40 = vunpack.c.h.bf16 %v646_v24 }
  0x56   :  { %v217_v41 = vsub.f32 %v584_v29, %v779_v5  ;;  %v218_v47 = vsub.f32 %v587_v34, %v779_v5 }
  0x57   :  { %v266_v28 = vadd.f32 %v265_v23, %v202_v22  ;;  %v401_v52 = vadd.f32 %v400_v46, %v338_v45  ;;  %v345_v22 = vmul.f32 %v208_v58, %v208_v58  ;;  %v583_v23 = vunpack.c.l.bf16 %v645_v15  ;;  %v648_v46 = vld [vmem:[#allocation5 + $0xc0] sm:$0xff]  }
  0x58   :  { %v591_v45 = vunpack.c.l.bf16 %v647_v35 }
  0x59   :  { %v267_v33 = vadd.f32 %v266_v28, %v203_v27  ;;  %v402_v56 = vadd.f32 %v401_v52, %v339_v51  ;;  %v346_v27 = vmul.f32 %v209_v62, %v209_v62  ;;  %v216_v36 = vsub.f32 %v583_v23, %v779_v5 }
  0x5a   :  { %v592_v51 = vunpack.c.h.bf16 %v647_v35  ;;  %v219_v52 = vsub.f32 %v588_v40, %v779_v5 }
  0x5b   :  { %v268_v39 = vadd.f32 %v267_v33, %v204_v32  ;;  %v403_v61 = vadd.f32 %v402_v56, %v340_v55  ;;  %v347_v32 = vmul.f32 %v210_v3, %v210_v3  ;;  %v595_v56 = vunpack.c.l.bf16 %v648_v46 }
  0x5d   :  { %v269_v44 = vadd.f32 %v268_v39, %v205_v38  ;;  %v404_v2 = vadd.f32 %v403_v61, %v341_v60  ;;  %v348_v38 = vmul.f32 %v211_v10, %v211_v10  ;;  %v352_v60 = vmul.f32 %v215_v30, %v215_v30 }
  0x5e   :  { %v222_v6 = vsub.f32 %v595_v56, %v779_v5 }
  0x5f   :  { %v270_v50 = vadd.f32 %v269_v44, %v206_v43  ;;  %v405_v9 = vadd.f32 %v404_v2, %v342_v1  ;;  %v349_v43 = vmul.f32 %v212_v16, %v212_v16  ;;  %v353_v1 = vmul.f32 %v216_v36, %v216_v36 }
  0x60   :  { %v359_v35 = vmul.f32 %v222_v6, %v222_v6 }
  0x61   :  { %v271_v54 = vadd.f32 %v270_v50, %v207_v49  ;;  %v406_v13 = vadd.f32 %v405_v9, %v343_v8  ;;  %v350_v49 = vmul.f32 %v213_v20, %v213_v20  ;;  %v354_v8 = vmul.f32 %v217_v41, %v217_v41 }
  0x63   :  { %v272_v63 = vadd.f32 %v271_v54, %v208_v58  ;;  %v407_v19 = vadd.f32 %v406_v13, %v344_v12  ;;  %v351_v54 = vmul.f32 %v214_v25, %v214_v25  ;;  %v220_v58 = vsub.f32 %v591_v45, %v779_v5 }
  0x64   :  { %v355_v13 = vmul.f32 %v218_v47, %v218_v47 }
  0x65   :  { %v273_v4 = vadd.f32 %v272_v63, %v209_v62  ;;  %v408_v28 = vadd.f32 %v407_v19, %v345_v22  ;;  %v596_v62 = vunpack.c.h.bf16 %v648_v46  ;;  %v221_v63 = vsub.f32 %v592_v51, %v779_v5 }
  0x66   :  { %v356_v19 = vmul.f32 %v219_v52, %v219_v52  ;;  %v357_v24 = vmul.f32 %v220_v58, %v220_v58 }
  0x67   :  { %v274_v11 = vadd.f32 %v273_v4, %v210_v3  ;;  %v409_v33 = vadd.f32 %v408_v28, %v346_v27  ;;  %v599_v3 = vunpack.c.l.bf16 %v649_v57  ;;  %v650_v4 = vld [vmem:[#allocation5 + $0xd0] sm:$0xff]   ;;  %v652_v27 = vld [vmem:[#allocation5 + $0xe0] sm:$0xff]  }
  0x68   :  { %v603_v15 = vunpack.c.l.bf16 %v650_v4 }
  0x69   :  { %v275_v17 = vadd.f32 %v274_v11, %v211_v10  ;;  %v410_v39 = vadd.f32 %v409_v33, %v347_v32  ;;  %v600_v10 = vunpack.c.h.bf16 %v649_v57  ;;  %v223_v11 = vsub.f32 %v596_v62, %v779_v5 }
  0x6a   :  { %v226_v28 = vsub.f32 %v603_v15, %v779_v5 }
  0x6b   :  { %v276_v21 = vadd.f32 %v275_v17, %v212_v16  ;;  %v411_v44 = vadd.f32 %v410_v39, %v348_v38  ;;  %v651_v16 = vld [vmem:[#allocation5 + $0xd8] sm:$0xff]   ;;  %v224_v17 = vsub.f32 %v599_v3, %v779_v5  ;;  %v225_v22 = vsub.f32 %v600_v10, %v779_v5  ;;  %v653_v38 = vld [vmem:[#allocation5 + $0xe8] sm:$0xff]  }
  0x6c   :  { %v608_v32 = vunpack.c.h.bf16 %v651_v16  ;;  %v363_v57 = vmul.f32 %v226_v28, %v226_v28 }
  0x6d   :  { %v277_v26 = vadd.f32 %v276_v21, %v213_v20  ;;  %v412_v50 = vadd.f32 %v411_v44, %v349_v43  ;;  %v604_v21 = vunpack.c.h.bf16 %v650_v4  ;;  %v612_v43 = vunpack.c.h.bf16 %v652_v27 }
  0x6e   :  { %v229_v44 = vsub.f32 %v608_v32, %v779_v5  ;;  %v361_v46 = vmul.f32 %v224_v17, %v224_v17 }
  0x6f   :  { %v278_v31 = vadd.f32 %v277_v26, %v214_v25  ;;  %v413_v55 = vadd.f32 %v412_v50, %v350_v49  ;;  %v607_v26 = vunpack.c.l.bf16 %v651_v16  ;;  %v227_v33 = vsub.f32 %v604_v21, %v779_v5  ;;  %v654_v49 = vld [vmem:[#allocation5 + $0xf0] sm:$0xff]  }
  0x70   :  { %v366_v10 = vmul.f32 %v229_v44, %v229_v44 }
  0x71   :  { %v279_v37 = vadd.f32 %v278_v31, %v215_v30  ;;  %v414_v61 = vadd.f32 %v413_v55, %v351_v54  ;;  %v358_v30 = vmul.f32 %v221_v63, %v221_v63  ;;  %v228_v39 = vsub.f32 %v607_v26, %v779_v5 }
  0x72   :  { %v616_v54 = vunpack.c.h.bf16 %v653_v38  ;;  %v231_v55 = vsub.f32 %v612_v43, %v779_v5 }
  0x73   :  { %v280_v42 = vadd.f32 %v279_v37, %v216_v36  ;;  %v415_v2 = vadd.f32 %v414_v61, %v352_v60  ;;  %v611_v37 = vunpack.c.l.bf16 %v652_v27  ;;  %v655_v60 = vld [vmem:[#allocation5 + $0xf8] sm:$0xff]   ;;  %v365_v4 = vmul.f32 %v228_v39, %v228_v39 }
  0x75   :  { %v281_v48 = vadd.f32 %v280_v42, %v217_v41  ;;  %v416_v9 = vadd.f32 %v415_v2, %v353_v1  ;;  %v360_v41 = vmul.f32 %v223_v11, %v223_v11  ;;  %v230_v50 = vsub.f32 %v611_v37, %v779_v5 }
  0x76   :  { %v620_v1 = vunpack.c.h.bf16 %v654_v49  ;;  %v233_v2 = vsub.f32 %v616_v54, %v779_v5 }
  0x77   :  { %v282_v53 = vadd.f32 %v281_v48, %v218_v47  ;;  %v417_v14 = vadd.f32 %v416_v9, %v354_v8  ;;  %v615_v48 = vunpack.c.l.bf16 %v653_v38  ;;  %v367_v15 = vmul.f32 %v230_v50, %v230_v50 }
  0x78   :  { %v370_v26 = vmul.f32 %v233_v2, %v233_v2 }
  0x79   :  { %v283_v59 = vadd.f32 %v282_v53, %v219_v52  ;;  %v418_v20 = vadd.f32 %v417_v14, %v355_v13  ;;  %v362_v52 = vmul.f32 %v225_v22, %v225_v22  ;;  %v232_v61 = vsub.f32 %v615_v48, %v779_v5 }
  0x7a   :  { %v235_v13 = vsub.f32 %v620_v1, %v779_v5  ;;  %v463_v1 = vld [vmem:[%s877_s2] sm:$0x1] }
  0x7b   :  { %v284_v0 = vadd.f32 %v283_v59, %v220_v58  ;;  %v419_v25 = vadd.f32 %v418_v20, %v356_v19  ;;  %v619_v59 = vunpack.c.l.bf16 %v654_v49  ;;  %v368_v19 = vmul.f32 %v231_v55, %v231_v55  ;;  %v310_v49 = vld [vmem:[#allocation4] sm:$0x1] }
  0x7c   :  { %v372_v32 = vmul.f32 %v235_v13, %v235_v13 }
  0x7d   :  { %v285_v7 = vadd.f32 %v284_v0, %v221_v63  ;;  %v420_v31 = vadd.f32 %v419_v25, %v357_v24  ;;  %v364_v63 = vmul.f32 %v227_v33, %v227_v33  ;;  %v234_v8 = vsub.f32 %v619_v59, %v779_v5 }
  0x7f   :  { %v286_v12 = vadd.f32 %v285_v7, %v222_v6  ;;  %v421_v36 = vadd.f32 %v420_v31, %v358_v30  ;;  %v623_v7 = vunpack.c.l.bf16 %v655_v60 }
  0x81   :  { %v287_v18 = vadd.f32 %v286_v12, %v223_v11  ;;  %v422_v42 = vadd.f32 %v421_v36, %v359_v35  ;;  %v624_v12 = vunpack.c.h.bf16 %v655_v60  ;;  %v458_v60 = vld [vmem:[%s876_s1] sm:$0x1] }
  0x83   :  { %v288_v23 = vadd.f32 %v287_v18, %v224_v17  ;;  %v423_v47 = vadd.f32 %v422_v42, %v360_v41  ;;  %v236_v17 = vsub.f32 %v623_v7, %v779_v5  ;;  %v237_v21 = vsub.f32 %v624_v12, %v779_v5  ;;  %v238_v41 = vld [vmem:[#allocation3] sm:$0x1] }
  0x85   :  { %v289_v29 = vadd.f32 %v288_v23, %v225_v22  ;;  %v424_v53 = vadd.f32 %v423_v47, %v361_v46  ;;  %v369_v23 = vmul.f32 %v232_v61, %v232_v61  ;;  %v373_v35 = vmul.f32 %v236_v17, %v236_v17 }
  0x86   :  { %v374_v38 = vmul.f32 %v237_v21, %v237_v21 }
  0x87   :  { %v290_v34 = vadd.f32 %v289_v29, %v226_v28  ;;  %v425_v58 = vadd.f32 %v424_v53, %v362_v52  ;;  %v371_v29 = vmul.f32 %v234_v8, %v234_v8 }
  0x89   :  { %v291_v40 = vadd.f32 %v290_v34, %v227_v33  ;;  %v426_v0 = vadd.f32 %v425_v58, %v363_v57 }
  0x8b   :  { %v292_v45 = vadd.f32 %v291_v40, %v228_v39  ;;  %v427_v6 = vadd.f32 %v426_v0, %v364_v63 }
  0x8d   :  { %v293_v51 = vadd.f32 %v292_v45, %v229_v44  ;;  %v428_v11 = vadd.f32 %v427_v6, %v365_v4 }
  0x8f   :  { %v294_v56 = vadd.f32 %v293_v51, %v230_v50  ;;  %v429_v16 = vadd.f32 %v428_v11, %v366_v10 }
  0x91   :  { %v295_v62 = vadd.f32 %v294_v56, %v231_v55  ;;  %v430_v20 = vadd.f32 %v429_v16, %v367_v15 }
  0x93   :  { %v296_v3 = vadd.f32 %v295_v62, %v232_v61  ;;  %v431_v24 = vadd.f32 %v430_v20, %v368_v19  ;;  %v456_v62 = vld [vmem:[#allocation2] sm:$0x1] }
  0x95   :  { %v297_v9 = vadd.f32 %v296_v3, %v233_v2  ;;  %v432_v27 = vadd.f32 %v431_v24, %v369_v23 }
  0x97   :  { %v298_v14 = vadd.f32 %v297_v9, %v234_v8  ;;  %v433_v30 = vadd.f32 %v432_v27, %v370_v26 }
  0x99   :  { %v299_v18 = vadd.f32 %v298_v14, %v235_v13  ;;  %v434_v33 = vadd.f32 %v433_v30, %v371_v29 }
  0x9b   :  { %v300_v22 = vadd.f32 %v299_v18, %v236_v17  ;;  %v435_v36 = vadd.f32 %v434_v33, %v372_v32 }
  0x9d   :  { %v301_v25 = vadd.f32 %v300_v22, %v237_v21  ;;  %v436_v39 = vadd.f32 %v435_v36, %v373_v35 }
  0x9f   :  { %v302_v28 = vrot.slane %v301_v25, 4  ;;  %v437_v5 = vadd.f32 %v436_v39, %v374_v38 }
  0xa1   :  { %v303_v31 = vadd.f32 %v302_v28, %v301_v25  ;;  %v438_v43 = vrot.slane %v437_v5, 4 }
  0xa3   :  { %v304_v34 = vrot.slane %v303_v31, 2  ;;  %v439_v45 = vadd.f32 %v438_v43, %v437_v5 }
  0xa5   :  { %v305_v37 = vadd.f32 %v304_v34, %v303_v31  ;;  %v440_v46 = vrot.slane %v439_v45, 2 }
  0xa7   :  { %v306_v40 = vrot.slane %v305_v37, 1  ;;  %v441_v47 = vadd.f32 %v440_v46, %v439_v45 }
  0xa9   :  { %v307_v42 = vadd.f32 %v306_v40, %v305_v37  ;;  %v442_v48 = vrot.slane %v441_v47, 1 }
  0xab   :  { %v308_v44 = vadd.f32 %v307_v42, %v238_v41  ;;  %v443_v50 = vadd.f32 %v442_v48, %v441_v47 }
  0xad   :  { %309 = vst [vmem:[#allocation3] sm:$0x1] %v308_v44  ;;  %v444_v51 = vadd.f32 %v443_v50, %v310_v49 }
  0xaf   :  { %445 = vst [vmem:[#allocation4] sm:$0x1] %v444_v51 }
  0xb4   :  { %v449_v52 = vld [vmem:[#allocation3] sm:$0x1] }
  0xb5   :  { %v450_v53 = vmul.f32 0.001953125, %v449_v52 }
  0xb6   :  { %v451_v55 = vld [vmem:[#allocation4] sm:$0x1] }
  0xb7   :  { %v453_v54 = vmul.f32 %v450_v53, %v450_v53  ;;  %v452_v56 = vmul.f32 0.001953125, %v451_v55  ;;  %v457_v0 = vadd.f32 %v456_v62, %v450_v53 }
  0xb9   :  { %v454_v57 = vsub.f32 %v452_v56, %v453_v54 }
  0xbb   :  { %v455_v58 = vmax.f32 %v454_v57, 0.0 }
  0xbd   :  { %v459_v59 = vadd.f32 1e-05, %v455_v58 }
  0xbf   :  { %662 = vrsqrt.f32 %v459_v59 }
  0xc9   :  { %v663_v61 = vpop.eup %662 }
  0xca   :  { %v461_v63 = vmul.f32 %v663_v61, %v458_v60 }
  0xcc   :  { %462 = vst [vmem:[#allocation8] sm:$0x1] %v461_v63  ;;  %v464_v2 = vmul.f32 %v461_v63, %v457_v0 }
  0xcd   :  { %697 = shalt.err (!%p694_p12)
}
  0xce   :  { %s698_s13 = scalar_lea.hbm %s878_s3, 16 }
  0xcf   :  { %p699_p13 = scmp.ne.s32.totalorder %s878_s3, %s698_s13  ;;  %p702_p0 = scmp.lt.u32.totalorder %s698_s13, %s878_s3 }
  0xd1   :  { %p704_p1 = pnand %p702_p0, %p699_p13 }
  0xd3   :  { %707 = shalt.err (!%p704_p1)
}
  0xd4   :  { %476 = dma.vmem_to_hbm [thread:$0]  %s474_s5, 16, %s878_s3, [#allocation7]   ;;  %v465_v3 = vsub.f32 %v463_v1, %v464_v2 }
  0xd5   :  { %s708_s19 = scalar_lea.vmem %s484_s9, 16  ;;  %s712_s20 = scalar_lea.vmem %s484_s9, 32 }
  0xd6   :  { %466 = vst [vmem:[#allocation9] sm:$0x1] %v465_v3  ;;  %p709_p2 = scmp.ne.s32.totalorder %s484_s9, %s708_s19  ;;  %p713_p3 = scmp.lt.s32.totalorder %s484_s9, %s484_s9 }
  0xd7   :  { %p714_p4 = scmp.lt.s32.totalorder %s712_s20, %s708_s19 }
  0xd9   :  { %p715_p5 = por %p714_p4, %p713_p3 }
  0xdb   :  { %p716_p6 = pnand %p715_p5, %p709_p2 }
  0xdd   :  { %719 = shalt.err (!%p716_p6)
}
  0xde   :  { %s720_s23 = scalar_lea.hbm %s879_s4, 16 }
  0xdf   :  { %p721_p7 = scmp.ne.s32.totalorder %s879_s4, %s720_s23  ;;  %p724_p8 = scmp.lt.u32.totalorder %s720_s23, %s879_s4 }
  0xe1   :  { %p726_p9 = pnand %p724_p8, %p721_p7 }
  0xe3   :  { %729 = shalt.err (!%p726_p9)
}
  0xe4   :  { %486 = dma.vmem_to_hbm [thread:$0]  %s484_s9, 16, %s879_s4, [#allocation10]  }
  0xe5   :  { %732 = dma.done.wait [#allocation7], 16  }
  0xe6   :  { %733 = vsyncadd [#allocation7], 4294967280 }
  0xe7   :  { %734 = dma.done.wait [#allocation10], 16  }
  0xe8   :  { %735 = vsyncadd [#allocation10], 4294967280 }
  0xe9   :  { %493 = vsyncpa [#allocation6], 1 }
  0xea   :  { %494 = vsyncpa [#allocation7], 1 }
  0xeb   :  { %495 = vsyncpa [#allocation10], 1 }

</bundles_post_ra>
